<compile_context>
chip_gen: v7x
topology: tpu7x:2x2x1
jax: 0.10.0
libtpu: 0.0.40
codegen_flags: <defaults>
</compile_context>

<pallas_src>
import functools

import jax
import jax.numpy as jnp
from jax.experimental import pallas as pl
from jax.experimental.pallas import tpu as pltpu


def lstm_fc_kernel(x_ref, wih_ref, whh_ref, b_ref, fcw_ref, fcb_ref, out_ref,
                   *, batch, recur_on_mxu=False):
    """Full forward pass of LSTMModel for one (small) batch, entirely in VMEM.

    x_ref   : (T*B, 1)    time-major input, flattened (row t*B+b == timestep t, batch b)
    wih_ref : (1, 4H)     fused input weights, gate order (i, f, o, g); i/f/o cols pre-scaled 0.5
    whh_ref : (H, 4H)     fused recurrent weights, same order/scaling
    b_ref   : (1, 4H)     fused bias (bias_ih + bias_hh), same order/scaling
    fcw_ref : (1, H)      fc1 weight
    fcb_ref : (1, 1)      fc1 bias
    out_ref : (B, 1)
    """
    TB = x_ref.shape[0]
    B = batch
    T = TB // B
    H = whh_ref.shape[0]
    half = jnp.float32(0.5)

    whh = whh_ref[...]                                    # (H, 4H)
    # Input projection + bias for every timestep in one slab (input_size == 1 so it is
    # a broadcast-multiply): (T*B, 4H).
    gates_x = x_ref[...] * wih_ref[...] + b_ref[...]

    # Hoist the recurrent-row broadcasts out of the unrolled time loop
    # (JAX does not CSE broadcast_in_dim: would otherwise emit T*H of them).
    whh_rows = [jnp.broadcast_to(whh[j:j + 1, :], (B, 4 * H)) for j in range(H)]

    h = jnp.zeros((B, H), jnp.float32)
    c = jnp.zeros((B, H), jnp.float32)

    # T is static -> loop fully unrolled at trace time (LLO sees across timesteps).
    for t in range(T):
        pre = gates_x[t * B:(t + 1) * B, :]               # (B, 4H) static sublane slice
        if recur_on_mxu:
            # Single fused MXU dot (alternative path; 1 push/pop per serial step).
            pre = pre + jnp.dot(h, whh, preferred_element_type=jnp.float32)
        else:
            # H rank-1 VPU MACs; products are independent, summed as a balanced tree
            # so the dependent-add depth is ~3 instead of H on the critical path.
            prods = [h[:, j:j + 1] * whh_rows[j] for j in range(H)]
            while len(prods) > 1:
                nxt = [prods[a] + prods[a + 1] for a in range(0, len(prods) - 1, 2)]
                if len(prods) % 2:
                    nxt.append(prods[-1])
                prods = nxt
            pre = pre + prods[0]

        # ONE EUP tanh over all 4H lanes. i/f/o pre-activations were pre-scaled by 0.5
        # in the wrapper, so sigmoid(x) == 0.5 * tanh(x/2) + 0.5 (VALU FMA only).
        t_all = jnp.tanh(pre)                             # (B, 4H)
        ifo = half * t_all[:, :3 * H] + half
        i_g = ifo[:, 0 * H:1 * H]
        f_g = ifo[:, 1 * H:2 * H]
        o_g = ifo[:, 2 * H:3 * H]
        g_g = t_all[:, 3 * H:]

        c = f_g * c + i_g * g_g
        h = o_g * jnp.tanh(c)

    # Epilogue: fc1(relu(h_T)) as VPU multiply + lane reduce — avoids an MXU push/pop
    # (systolic fill + result-FIFO latency) right before the final store.
    out_ref[...] = (jnp.sum(jax.nn.relu(h) * fcw_ref[...], axis=1, keepdims=True)
                    + fcb_ref[...])


def init_params(key, input_size=1, hidden_size=5):
    """Deterministic parameter init mirroring the PyTorch module's shapes/init scale."""
    k = 1.0 / jnp.sqrt(hidden_size)
    keys = jax.random.split(key, 6)
    weight_ih = jax.random.uniform(keys[0], (4 * hidden_size, input_size), jnp.float32, -k, k)
    weight_hh = jax.random.uniform(keys[1], (4 * hidden_size, hidden_size), jnp.float32, -k, k)
    bias_ih = jax.random.uniform(keys[2], (4 * hidden_size,), jnp.float32, -k, k)
    bias_hh = jax.random.uniform(keys[3], (4 * hidden_size,), jnp.float32, -k, k)
    kf = 1.0 / jnp.sqrt(hidden_size)  # fc1 in_features = hidden_size
    fc_w = jax.random.uniform(keys[4], (1, hidden_size), jnp.float32, -kf, kf)
    fc_b = jax.random.uniform(keys[5], (1,), jnp.float32, -kf, kf)
    return dict(weight_ih=weight_ih, weight_hh=weight_hh,
                bias_ih=bias_ih, bias_hh=bias_hh, fc_w=fc_w, fc_b=fc_b)


# PyTorch gate order in weight_ih_l0 / weight_hh_l0 rows is (i, f, g, o);
# the kernel packs (i, f, o, g) so the single tanh + 0.5*t+0.5 rewrite covers
# one contiguous 3H lane slice (i/f/o) and one contiguous H slice (g).
_GATE_PERM = (0, 1, 3, 2)


def lstm_model_forward(x, params, hidden_size=5, recur_on_mxu=False):
    """x: (B, T, 1) batch-first float32, like the PyTorch module. Returns (B, 1)."""
    B, T, _ = x.shape
    H = hidden_size
    perm = jnp.asarray(_GATE_PERM)

    # Parameter reshaping / gate fusion in plain JAX (glue, runs once).
    # i/f/o columns pre-scaled by 0.5 so the kernel can use sigmoid(x)=0.5*tanh(x/2)+0.5.
    gate_scale = jnp.concatenate([jnp.full((3 * H,), 0.5, jnp.float32),
                                  jnp.ones((H,), jnp.float32)]).reshape(1, 4 * H)

    x_flat = jnp.transpose(x, (1, 0, 2)).reshape(T * B, 1)                     # (T*B, 1)
    wih_all = (params["weight_ih"][:, 0].reshape(4, H)[perm].reshape(1, 4 * H)
               * gate_scale)                                                    # (1, 4H)
    whh_all = (params["weight_hh"].reshape(4, H, H)[perm]
               .transpose(2, 0, 1).reshape(H, 4 * H) * gate_scale)              # (H, 4H)
    b_all = ((params["bias_ih"] + params["bias_hh"]).reshape(4, H)[perm]
             .reshape(1, 4 * H) * gate_scale)                                   # (1, 4H)
    fcw = params["fc_w"].reshape(1, H)                                          # (1, H)
    fcb = params["fc_b"].reshape(1, 1)                                          # (1, 1)

    vmem = pl.BlockSpec(memory_space=pltpu.MemorySpace.VMEM)
    kernel = functools.partial(lstm_fc_kernel, batch=B, recur_on_mxu=recur_on_mxu)
    # TODO(synk): for large batch, add a grid over B with
    # dimension_semantics=("parallel",) (uses both v7x TensorCores) and a lane-dense
    # output slab instead of (B, 1) to avoid masked partial stores.
    return pl.pallas_call(
        kernel,
        out_shape=jax.ShapeDtypeStruct((B, 1), jnp.float32),
        in_specs=[vmem] * 6,
        out_specs=vmem,
    )(x_flat, wih_all, whh_all, b_all, fcw, fcb)


def lstm_model_reference(x, params, hidden_size=5):
    """Pure-JAX reference of the same forward pass, for verification."""
    B, T, _ = x.shape
    H = hidden_size
    w_ih, w_hh = params["weight_ih"], params["weight_hh"]
    b = params["bias_ih"] + params["bias_hh"]
    h = jnp.zeros((B, H), jnp.float32)
    c = jnp.zeros((B, H), jnp.float32)
    for t in range(T):
        x_t = x[:, t, :]                       # (B, 1)
        gates = x_t @ w_ih.T + h @ w_hh.T + b  # (B, 4H), PyTorch order i, f, g, o
        i = jax.nn.sigmoid(gates[:, 0 * H:1 * H])
        f = jax.nn.sigmoid(gates[:, 1 * H:2 * H])
        g = jnp.tanh(gates[:, 2 * H:3 * H])
        o = jax.nn.sigmoid(gates[:, 3 * H:4 * H])
        c = f * c + i * g
        h = o * jnp.tanh(c)
    return jax.nn.relu(h) @ params["fc_w"].T + params["fc_b"]


if __name__ == "__main__":
    key = jax.random.PRNGKey(0)
    k_param, k_x = jax.random.split(key)

    B, T, H = 2, 8, 5
    params = init_params(k_param, input_size=1, hidden_size=H)
    x = jax.random.normal(k_x, (B, T, 1), jnp.float32)

    out = lstm_model_forward(x, params, hidden_size=H)
    out = jax.block_until_ready(out)

    ref = lstm_model_reference(x, params, hidden_size=H)
    assert out.shape == (B, 1)
    assert jnp.allclose(out, ref, atol=1e-5, rtol=1e-5), (out, ref)

    print("KERNEL_OK")
</pallas_src>

<mosaic_0001>
module attributes {stable_mosaic.version = 11 : i64} {
  func.func @lstm_fc_kernel(%arg0: memref<16x1xf32, #tpu.memory_space<vmem>>, %arg1: memref<1x20xf32, #tpu.memory_space<vmem>>, %arg2: memref<5x20xf32, #tpu.memory_space<vmem>>, %arg3: memref<1x20xf32, #tpu.memory_space<vmem>>, %arg4: memref<1x5xf32, #tpu.memory_space<vmem>>, %arg5: memref<1x1xf32, #tpu.memory_space<vmem>>, %arg6: memref<2x1xf32, #tpu.memory_space<vmem>>) attributes {dimension_semantics = [], scalar_prefetch = 0 : i64, scratch_operands = 0 : i64, tpu.core_type = #tpu.core_type<tc>} {
    %c0 = arith.constant 0 : index
    %c0_0 = arith.constant 0 : index
    %0 = vector.load %arg2[%c0, %c0_0] : memref<5x20xf32, #tpu.memory_space<vmem>>, vector<5x20xf32>
    %c0_1 = arith.constant 0 : index
    %c0_2 = arith.constant 0 : index
    %1 = vector.load %arg0[%c0_1, %c0_2] : memref<16x1xf32, #tpu.memory_space<vmem>>, vector<16x1xf32>
    %c0_3 = arith.constant 0 : index
    %c0_4 = arith.constant 0 : index
    %2 = vector.load %arg1[%c0_3, %c0_4] : memref<1x20xf32, #tpu.memory_space<vmem>>, vector<1x20xf32>
    %3 = vector.broadcast %1 : vector<16x1xf32> to vector<16x20xf32>
    %4 = vector.broadcast %2 : vector<1x20xf32> to vector<16x20xf32>
    %5 = arith.mulf %3, %4 : vector<16x20xf32>
    %c0_5 = arith.constant 0 : index
    %c0_6 = arith.constant 0 : index
    %6 = vector.load %arg3[%c0_5, %c0_6] : memref<1x20xf32, #tpu.memory_space<vmem>>, vector<1x20xf32>
    %7 = vector.broadcast %6 : vector<1x20xf32> to vector<16x20xf32>
    %8 = arith.addf %5, %7 : vector<16x20xf32>
    %9 = vector.extract_strided_slice %0 {offsets = [0, 0], sizes = [1, 20], strides = [1, 1]} : vector<5x20xf32> to vector<1x20xf32>
    %10 = vector.shape_cast %9 : vector<1x20xf32> to vector<1x20xf32>
    %11 = vector.broadcast %10 : vector<1x20xf32> to vector<2x20xf32>
    %12 = vector.extract_strided_slice %0 {offsets = [1, 0], sizes = [1, 20], strides = [1, 1]} : vector<5x20xf32> to vector<1x20xf32>
    %13 = vector.shape_cast %12 : vector<1x20xf32> to vector<1x20xf32>
    %14 = vector.broadcast %13 : vector<1x20xf32> to vector<2x20xf32>
    %15 = vector.extract_strided_slice %0 {offsets = [2, 0], sizes = [1, 20], strides = [1, 1]} : vector<5x20xf32> to vector<1x20xf32>
    %16 = vector.shape_cast %15 : vector<1x20xf32> to vector<1x20xf32>
    %17 = vector.broadcast %16 : vector<1x20xf32> to vector<2x20xf32>
    %18 = vector.extract_strided_slice %0 {offsets = [3, 0], sizes = [1, 20], strides = [1, 1]} : vector<5x20xf32> to vector<1x20xf32>
    %19 = vector.shape_cast %18 : vector<1x20xf32> to vector<1x20xf32>
    %20 = vector.broadcast %19 : vector<1x20xf32> to vector<2x20xf32>
    %21 = vector.extract_strided_slice %0 {offsets = [4, 0], sizes = [1, 20], strides = [1, 1]} : vector<5x20xf32> to vector<1x20xf32>
    %22 = vector.shape_cast %21 : vector<1x20xf32> to vector<1x20xf32>
    %23 = vector.broadcast %22 : vector<1x20xf32> to vector<2x20xf32>
    %cst = arith.constant 0.000000e+00 : f32
    %24 = vector.broadcast %cst : f32 to vector<2x5xf32>
    %cst_7 = arith.constant 0.000000e+00 : f32
    %25 = vector.broadcast %cst_7 : f32 to vector<2x5xf32>
    %26 = vector.extract_strided_slice %8 {offsets = [0, 0], sizes = [2, 20], strides = [1, 1]} : vector<16x20xf32> to vector<2x20xf32>
    %27 = vector.extract_strided_slice %24 {offsets = [0, 0], sizes = [2, 1], strides = [1, 1]} : vector<2x5xf32> to vector<2x1xf32>
    %28 = vector.broadcast %27 : vector<2x1xf32> to vector<2x20xf32>
    %29 = arith.mulf %28, %11 : vector<2x20xf32>
    %30 = vector.extract_strided_slice %24 {offsets = [0, 1], sizes = [2, 1], strides = [1, 1]} : vector<2x5xf32> to vector<2x1xf32>
    %31 = vector.broadcast %30 : vector<2x1xf32> to vector<2x20xf32>
    %32 = arith.mulf %31, %14 : vector<2x20xf32>
    %33 = vector.extract_strided_slice %24 {offsets = [0, 2], sizes = [2, 1], strides = [1, 1]} : vector<2x5xf32> to vector<2x1xf32>
    %34 = vector.broadcast %33 : vector<2x1xf32> to vector<2x20xf32>
    %35 = arith.mulf %34, %17 : vector<2x20xf32>
    %36 = vector.extract_strided_slice %24 {offsets = [0, 3], sizes = [2, 1], strides = [1, 1]} : vector<2x5xf32> to vector<2x1xf32>
    %37 = vector.broadcast %36 : vector<2x1xf32> to vector<2x20xf32>
    %38 = arith.mulf %37, %20 : vector<2x20xf32>
    %39 = vector.extract_strided_slice %24 {offsets = [0, 4], sizes = [2, 1], strides = [1, 1]} : vector<2x5xf32> to vector<2x1xf32>
    %40 = vector.broadcast %39 : vector<2x1xf32> to vector<2x20xf32>
    %41 = arith.mulf %40, %23 : vector<2x20xf32>
    %42 = arith.addf %29, %32 : vector<2x20xf32>
    %43 = arith.addf %35, %38 : vector<2x20xf32>
    %44 = arith.addf %42, %43 : vector<2x20xf32>
    %45 = arith.addf %44, %41 : vector<2x20xf32>
    %46 = arith.addf %26, %45 : vector<2x20xf32>
    %47 = math.tanh %46 : vector<2x20xf32>
    %48 = vector.extract_strided_slice %47 {offsets = [0, 0], sizes = [2, 15], strides = [1, 1]} : vector<2x20xf32> to vector<2x15xf32>
    %cst_8 = arith.constant 5.000000e-01 : f32
    %49 = vector.broadcast %cst_8 : f32 to vector<2x15xf32>
    %50 = arith.mulf %49, %48 : vector<2x15xf32>
    %cst_9 = arith.constant 5.000000e-01 : f32
    %51 = vector.broadcast %cst_9 : f32 to vector<2x15xf32>
    %52 = arith.addf %50, %51 : vector<2x15xf32>
    %53 = vector.extract_strided_slice %52 {offsets = [0, 0], sizes = [2, 5], strides = [1, 1]} : vector<2x15xf32> to vector<2x5xf32>
    %54 = vector.extract_strided_slice %52 {offsets = [0, 5], sizes = [2, 5], strides = [1, 1]} : vector<2x15xf32> to vector<2x5xf32>
    %55 = vector.extract_strided_slice %52 {offsets = [0, 10], sizes = [2, 5], strides = [1, 1]} : vector<2x15xf32> to vector<2x5xf32>
    %56 = vector.extract_strided_slice %47 {offsets = [0, 15], sizes = [2, 5], strides = [1, 1]} : vector<2x20xf32> to vector<2x5xf32>
    %57 = arith.mulf %54, %25 : vector<2x5xf32>
    %58 = arith.mulf %53, %56 : vector<2x5xf32>
    %59 = arith.addf %57, %58 : vector<2x5xf32>
    %60 = math.tanh %59 : vector<2x5xf32>
    %61 = arith.mulf %55, %60 : vector<2x5xf32>
    %62 = vector.extract_strided_slice %8 {offsets = [2, 0], sizes = [2, 20], strides = [1, 1]} : vector<16x20xf32> to vector<2x20xf32>
    %63 = vector.extract_strided_slice %61 {offsets = [0, 0], sizes = [2, 1], strides = [1, 1]} : vector<2x5xf32> to vector<2x1xf32>
    %64 = vector.broadcast %63 : vector<2x1xf32> to vector<2x20xf32>
    %65 = arith.mulf %64, %11 : vector<2x20xf32>
    %66 = vector.extract_strided_slice %61 {offsets = [0, 1], sizes = [2, 1], strides = [1, 1]} : vector<2x5xf32> to vector<2x1xf32>
    %67 = vector.broadcast %66 : vector<2x1xf32> to vector<2x20xf32>
    %68 = arith.mulf %67, %14 : vector<2x20xf32>
    %69 = vector.extract_strided_slice %61 {offsets = [0, 2], sizes = [2, 1], strides = [1, 1]} : vector<2x5xf32> to vector<2x1xf32>
    %70 = vector.broadcast %69 : vector<2x1xf32> to vector<2x20xf32>
    %71 = arith.mulf %70, %17 : vector<2x20xf32>
    %72 = vector.extract_strided_slice %61 {offsets = [0, 3], sizes = [2, 1], strides = [1, 1]} : vector<2x5xf32> to vector<2x1xf32>
    %73 = vector.broadcast %72 : vector<2x1xf32> to vector<2x20xf32>
    %74 = arith.mulf %73, %20 : vector<2x20xf32>
    %75 = vector.extract_strided_slice %61 {offsets = [0, 4], sizes = [2, 1], strides = [1, 1]} : vector<2x5xf32> to vector<2x1xf32>
    %76 = vector.broadcast %75 : vector<2x1xf32> to vector<2x20xf32>
    %77 = arith.mulf %76, %23 : vector<2x20xf32>
    %78 = arith.addf %65, %68 : vector<2x20xf32>
    %79 = arith.addf %71, %74 : vector<2x20xf32>
    %80 = arith.addf %78, %79 : vector<2x20xf32>
    %81 = arith.addf %80, %77 : vector<2x20xf32>
    %82 = arith.addf %62, %81 : vector<2x20xf32>
    %83 = math.tanh %82 : vector<2x20xf32>
    %84 = vector.extract_strided_slice %83 {offsets = [0, 0], sizes = [2, 15], strides = [1, 1]} : vector<2x20xf32> to vector<2x15xf32>
    %cst_10 = arith.constant 5.000000e-01 : f32
    %85 = vector.broadcast %cst_10 : f32 to vector<2x15xf32>
    %86 = arith.mulf %85, %84 : vector<2x15xf32>
    %cst_11 = arith.constant 5.000000e-01 : f32
    %87 = vector.broadcast %cst_11 : f32 to vector<2x15xf32>
    %88 = arith.addf %86, %87 : vector<2x15xf32>
    %89 = vector.extract_strided_slice %88 {offsets = [0, 0], sizes = [2, 5], strides = [1, 1]} : vector<2x15xf32> to vector<2x5xf32>
    %90 = vector.extract_strided_slice %88 {offsets = [0, 5], sizes = [2, 5], strides = [1, 1]} : vector<2x15xf32> to vector<2x5xf32>
    %91 = vector.extract_strided_slice %88 {offsets = [0, 10], sizes = [2, 5], strides = [1, 1]} : vector<2x15xf32> to vector<2x5xf32>
    %92 = vector.extract_strided_slice %83 {offsets = [0, 15], sizes = [2, 5], strides = [1, 1]} : vector<2x20xf32> to vector<2x5xf32>
    %93 = arith.mulf %90, %59 : vector<2x5xf32>
    %94 = arith.mulf %89, %92 : vector<2x5xf32>
    %95 = arith.addf %93, %94 : vector<2x5xf32>
    %96 = math.tanh %95 : vector<2x5xf32>
    %97 = arith.mulf %91, %96 : vector<2x5xf32>
    %98 = vector.extract_strided_slice %8 {offsets = [4, 0], sizes = [2, 20], strides = [1, 1]} : vector<16x20xf32> to vector<2x20xf32>
    %99 = vector.extract_strided_slice %97 {offsets = [0, 0], sizes = [2, 1], strides = [1, 1]} : vector<2x5xf32> to vector<2x1xf32>
    %100 = vector.broadcast %99 : vector<2x1xf32> to vector<2x20xf32>
    %101 = arith.mulf %100, %11 : vector<2x20xf32>
    %102 = vector.extract_strided_slice %97 {offsets = [0, 1], sizes = [2, 1], strides = [1, 1]} : vector<2x5xf32> to vector<2x1xf32>
    %103 = vector.broadcast %102 : vector<2x1xf32> to vector<2x20xf32>
    %104 = arith.mulf %103, %14 : vector<2x20xf32>
    %105 = vector.extract_strided_slice %97 {offsets = [0, 2], sizes = [2, 1], strides = [1, 1]} : vector<2x5xf32> to vector<2x1xf32>
    %106 = vector.broadcast %105 : vector<2x1xf32> to vector<2x20xf32>
    %107 = arith.mulf %106, %17 : vector<2x20xf32>
    %108 = vector.extract_strided_slice %97 {offsets = [0, 3], sizes = [2, 1], strides = [1, 1]} : vector<2x5xf32> to vector<2x1xf32>
    %109 = vector.broadcast %108 : vector<2x1xf32> to vector<2x20xf32>
    %110 = arith.mulf %109, %20 : vector<2x20xf32>
    %111 = vector.extract_strided_slice %97 {offsets = [0, 4], sizes = [2, 1], strides = [1, 1]} : vector<2x5xf32> to vector<2x1xf32>
    %112 = vector.broadcast %111 : vector<2x1xf32> to vector<2x20xf32>
    %113 = arith.mulf %112, %23 : vector<2x20xf32>
    %114 = arith.addf %101, %104 : vector<2x20xf32>
    %115 = arith.addf %107, %110 : vector<2x20xf32>
    %116 = arith.addf %114, %115 : vector<2x20xf32>
    %117 = arith.addf %116, %113 : vector<2x20xf32>
    %118 = arith.addf %98, %117 : vector<2x20xf32>
    %119 = math.tanh %118 : vector<2x20xf32>
    %120 = vector.extract_strided_slice %119 {offsets = [0, 0], sizes = [2, 15], strides = [1, 1]} : vector<2x20xf32> to vector<2x15xf32>
    %cst_12 = arith.constant 5.000000e-01 : f32
    %121 = vector.broadcast %cst_12 : f32 to vector<2x15xf32>
    %122 = arith.mulf %121, %120 : vector<2x15xf32>
    %cst_13 = arith.constant 5.000000e-01 : f32
    %123 = vector.broadcast %cst_13 : f32 to vector<2x15xf32>
    %124 = arith.addf %122, %123 : vector<2x15xf32>
    %125 = vector.extract_strided_slice %124 {offsets = [0, 0], sizes = [2, 5], strides = [1, 1]} : vector<2x15xf32> to vector<2x5xf32>
    %126 = vector.extract_strided_slice %124 {offsets = [0, 5], sizes = [2, 5], strides = [1, 1]} : vector<2x15xf32> to vector<2x5xf32>
    %127 = vector.extract_strided_slice %124 {offsets = [0, 10], sizes = [2, 5], strides = [1, 1]} : vector<2x15xf32> to vector<2x5xf32>
    %128 = vector.extract_strided_slice %119 {offsets = [0, 15], sizes = [2, 5], strides = [1, 1]} : vector<2x20xf32> to vector<2x5xf32>
    %129 = arith.mulf %126, %95 : vector<2x5xf32>
    %130 = arith.mulf %125, %128 : vector<2x5xf32>
    %131 = arith.addf %129, %130 : vector<2x5xf32>
    %132 = math.tanh %131 : vector<2x5xf32>
    %133 = arith.mulf %127, %132 : vector<2x5xf32>
    %134 = vector.extract_strided_slice %8 {offsets = [6, 0], sizes = [2, 20], strides = [1, 1]} : vector<16x20xf32> to vector<2x20xf32>
    %135 = vector.extract_strided_slice %133 {offsets = [0, 0], sizes = [2, 1], strides = [1, 1]} : vector<2x5xf32> to vector<2x1xf32>
    %136 = vector.broadcast %135 : vector<2x1xf32> to vector<2x20xf32>
    %137 = arith.mulf %136, %11 : vector<2x20xf32>
    %138 = vector.extract_strided_slice %133 {offsets = [0, 1], sizes = [2, 1], strides = [1, 1]} : vector<2x5xf32> to vector<2x1xf32>
    %139 = vector.broadcast %138 : vector<2x1xf32> to vector<2x20xf32>
    %140 = arith.mulf %139, %14 : vector<2x20xf32>
    %141 = vector.extract_strided_slice %133 {offsets = [0, 2], sizes = [2, 1], strides = [1, 1]} : vector<2x5xf32> to vector<2x1xf32>
    %142 = vector.broadcast %141 : vector<2x1xf32> to vector<2x20xf32>
    %143 = arith.mulf %142, %17 : vector<2x20xf32>
    %144 = vector.extract_strided_slice %133 {offsets = [0, 3], sizes = [2, 1], strides = [1, 1]} : vector<2x5xf32> to vector<2x1xf32>
    %145 = vector.broadcast %144 : vector<2x1xf32> to vector<2x20xf32>
    %146 = arith.mulf %145, %20 : vector<2x20xf32>
    %147 = vector.extract_strided_slice %133 {offsets = [0, 4], sizes = [2, 1], strides = [1, 1]} : vector<2x5xf32> to vector<2x1xf32>
    %148 = vector.broadcast %147 : vector<2x1xf32> to vector<2x20xf32>
    %149 = arith.mulf %148, %23 : vector<2x20xf32>
    %150 = arith.addf %137, %140 : vector<2x20xf32>
    %151 = arith.addf %143, %146 : vector<2x20xf32>
    %152 = arith.addf %150, %151 : vector<2x20xf32>
    %153 = arith.addf %152, %149 : vector<2x20xf32>
    %154 = arith.addf %134, %153 : vector<2x20xf32>
    %155 = math.tanh %154 : vector<2x20xf32>
    %156 = vector.extract_strided_slice %155 {offsets = [0, 0], sizes = [2, 15], strides = [1, 1]} : vector<2x20xf32> to vector<2x15xf32>
    %cst_14 = arith.constant 5.000000e-01 : f32
    %157 = vector.broadcast %cst_14 : f32 to vector<2x15xf32>
    %158 = arith.mulf %157, %156 : vector<2x15xf32>
    %cst_15 = arith.constant 5.000000e-01 : f32
    %159 = vector.broadcast %cst_15 : f32 to vector<2x15xf32>
    %160 = arith.addf %158, %159 : vector<2x15xf32>
    %161 = vector.extract_strided_slice %160 {offsets = [0, 0], sizes = [2, 5], strides = [1, 1]} : vector<2x15xf32> to vector<2x5xf32>
    %162 = vector.extract_strided_slice %160 {offsets = [0, 5], sizes = [2, 5], strides = [1, 1]} : vector<2x15xf32> to vector<2x5xf32>
    %163 = vector.extract_strided_slice %160 {offsets = [0, 10], sizes = [2, 5], strides = [1, 1]} : vector<2x15xf32> to vector<2x5xf32>
    %164 = vector.extract_strided_slice %155 {offsets = [0, 15], sizes = [2, 5], strides = [1, 1]} : vector<2x20xf32> to vector<2x5xf32>
    %165 = arith.mulf %162, %131 : vector<2x5xf32>
    %166 = arith.mulf %161, %164 : vector<2x5xf32>
    %167 = arith.addf %165, %166 : vector<2x5xf32>
    %168 = math.tanh %167 : vector<2x5xf32>
    %169 = arith.mulf %163, %168 : vector<2x5xf32>
    %170 = vector.extract_strided_slice %8 {offsets = [8, 0], sizes = [2, 20], strides = [1, 1]} : vector<16x20xf32> to vector<2x20xf32>
    %171 = vector.extract_strided_slice %169 {offsets = [0, 0], sizes = [2, 1], strides = [1, 1]} : vector<2x5xf32> to vector<2x1xf32>
    %172 = vector.broadcast %171 : vector<2x1xf32> to vector<2x20xf32>
    %173 = arith.mulf %172, %11 : vector<2x20xf32>
    %174 = vector.extract_strided_slice %169 {offsets = [0, 1], sizes = [2, 1], strides = [1, 1]} : vector<2x5xf32> to vector<2x1xf32>
    %175 = vector.broadcast %174 : vector<2x1xf32> to vector<2x20xf32>
    %176 = arith.mulf %175, %14 : vector<2x20xf32>
    %177 = vector.extract_strided_slice %169 {offsets = [0, 2], sizes = [2, 1], strides = [1, 1]} : vector<2x5xf32> to vector<2x1xf32>
    %178 = vector.broadcast %177 : vector<2x1xf32> to vector<2x20xf32>
    %179 = arith.mulf %178, %17 : vector<2x20xf32>
    %180 = vector.extract_strided_slice %169 {offsets = [0, 3], sizes = [2, 1], strides = [1, 1]} : vector<2x5xf32> to vector<2x1xf32>
    %181 = vector.broadcast %180 : vector<2x1xf32> to vector<2x20xf32>
    %182 = arith.mulf %181, %20 : vector<2x20xf32>
    %183 = vector.extract_strided_slice %169 {offsets = [0, 4], sizes = [2, 1], strides = [1, 1]} : vector<2x5xf32> to vector<2x1xf32>
    %184 = vector.broadcast %183 : vector<2x1xf32> to vector<2x20xf32>
    %185 = arith.mulf %184, %23 : vector<2x20xf32>
    %186 = arith.addf %173, %176 : vector<2x20xf32>
    %187 = arith.addf %179, %182 : vector<2x20xf32>
    %188 = arith.addf %186, %187 : vector<2x20xf32>
    %189 = arith.addf %188, %185 : vector<2x20xf32>
    %190 = arith.addf %170, %189 : vector<2x20xf32>
    %191 = math.tanh %190 : vector<2x20xf32>
    %192 = vector.extract_strided_slice %191 {offsets = [0, 0], sizes = [2, 15], strides = [1, 1]} : vector<2x20xf32> to vector<2x15xf32>
    %cst_16 = arith.constant 5.000000e-01 : f32
    %193 = vector.broadcast %cst_16 : f32 to vector<2x15xf32>
    %194 = arith.mulf %193, %192 : vector<2x15xf32>
    %cst_17 = arith.constant 5.000000e-01 : f32
    %195 = vector.broadcast %cst_17 : f32 to vector<2x15xf32>
    %196 = arith.addf %194, %195 : vector<2x15xf32>
    %197 = vector.extract_strided_slice %196 {offsets = [0, 0], sizes = [2, 5], strides = [1, 1]} : vector<2x15xf32> to vector<2x5xf32>
    %198 = vector.extract_strided_slice %196 {offsets = [0, 5], sizes = [2, 5], strides = [1, 1]} : vector<2x15xf32> to vector<2x5xf32>
    %199 = vector.extract_strided_slice %196 {offsets = [0, 10], sizes = [2, 5], strides = [1, 1]} : vector<2x15xf32> to vector<2x5xf32>
    %200 = vector.extract_strided_slice %191 {offsets = [0, 15], sizes = [2, 5], strides = [1, 1]} : vector<2x20xf32> to vector<2x5xf32>
    %201 = arith.mulf %198, %167 : vector<2x5xf32>
    %202 = arith.mulf %197, %200 : vector<2x5xf32>
    %203 = arith.addf %201, %202 : vector<2x5xf32>
    %204 = math.tanh %203 : vector<2x5xf32>
    %205 = arith.mulf %199, %204 : vector<2x5xf32>
    %206 = vector.extract_strided_slice %8 {offsets = [10, 0], sizes = [2, 20], strides = [1, 1]} : vector<16x20xf32> to vector<2x20xf32>
    %207 = vector.extract_strided_slice %205 {offsets = [0, 0], sizes = [2, 1], strides = [1, 1]} : vector<2x5xf32> to vector<2x1xf32>
    %208 = vector.broadcast %207 : vector<2x1xf32> to vector<2x20xf32>
    %209 = arith.mulf %208, %11 : vector<2x20xf32>
    %210 = vector.extract_strided_slice %205 {offsets = [0, 1], sizes = [2, 1], strides = [1, 1]} : vector<2x5xf32> to vector<2x1xf32>
    %211 = vector.broadcast %210 : vector<2x1xf32> to vector<2x20xf32>
    %212 = arith.mulf %211, %14 : vector<2x20xf32>
    %213 = vector.extract_strided_slice %205 {offsets = [0, 2], sizes = [2, 1], strides = [1, 1]} : vector<2x5xf32> to vector<2x1xf32>
    %214 = vector.broadcast %213 : vector<2x1xf32> to vector<2x20xf32>
    %215 = arith.mulf %214, %17 : vector<2x20xf32>
    %216 = vector.extract_strided_slice %205 {offsets = [0, 3], sizes = [2, 1], strides = [1, 1]} : vector<2x5xf32> to vector<2x1xf32>
    %217 = vector.broadcast %216 : vector<2x1xf32> to vector<2x20xf32>
    %218 = arith.mulf %217, %20 : vector<2x20xf32>
    %219 = vector.extract_strided_slice %205 {offsets = [0, 4], sizes = [2, 1], strides = [1, 1]} : vector<2x5xf32> to vector<2x1xf32>
    %220 = vector.broadcast %219 : vector<2x1xf32> to vector<2x20xf32>
    %221 = arith.mulf %220, %23 : vector<2x20xf32>
    %222 = arith.addf %209, %212 : vector<2x20xf32>
    %223 = arith.addf %215, %218 : vector<2x20xf32>
    %224 = arith.addf %222, %223 : vector<2x20xf32>
    %225 = arith.addf %224, %221 : vector<2x20xf32>
    %226 = arith.addf %206, %225 : vector<2x20xf32>
    %227 = math.tanh %226 : vector<2x20xf32>
    %228 = vector.extract_strided_slice %227 {offsets = [0, 0], sizes = [2, 15], strides = [1, 1]} : vector<2x20xf32> to vector<2x15xf32>
    %cst_18 = arith.constant 5.000000e-01 : f32
    %229 = vector.broadcast %cst_18 : f32 to vector<2x15xf32>
    %230 = arith.mulf %229, %228 : vector<2x15xf32>
    %cst_19 = arith.constant 5.000000e-01 : f32
    %231 = vector.broadcast %cst_19 : f32 to vector<2x15xf32>
    %232 = arith.addf %230, %231 : vector<2x15xf32>
    %233 = vector.extract_strided_slice %232 {offsets = [0, 0], sizes = [2, 5], strides = [1, 1]} : vector<2x15xf32> to vector<2x5xf32>
    %234 = vector.extract_strided_slice %232 {offsets = [0, 5], sizes = [2, 5], strides = [1, 1]} : vector<2x15xf32> to vector<2x5xf32>
    %235 = vector.extract_strided_slice %232 {offsets = [0, 10], sizes = [2, 5], strides = [1, 1]} : vector<2x15xf32> to vector<2x5xf32>
    %236 = vector.extract_strided_slice %227 {offsets = [0, 15], sizes = [2, 5], strides = [1, 1]} : vector<2x20xf32> to vector<2x5xf32>
    %237 = arith.mulf %234, %203 : vector<2x5xf32>
    %238 = arith.mulf %233, %236 : vector<2x5xf32>
    %239 = arith.addf %237, %238 : vector<2x5xf32>
    %240 = math.tanh %239 : vector<2x5xf32>
    %241 = arith.mulf %235, %240 : vector<2x5xf32>
    %242 = vector.extract_strided_slice %8 {offsets = [12, 0], sizes = [2, 20], strides = [1, 1]} : vector<16x20xf32> to vector<2x20xf32>
    %243 = vector.extract_strided_slice %241 {offsets = [0, 0], sizes = [2, 1], strides = [1, 1]} : vector<2x5xf32> to vector<2x1xf32>
    %244 = vector.broadcast %243 : vector<2x1xf32> to vector<2x20xf32>
    %245 = arith.mulf %244, %11 : vector<2x20xf32>
    %246 = vector.extract_strided_slice %241 {offsets = [0, 1], sizes = [2, 1], strides = [1, 1]} : vector<2x5xf32> to vector<2x1xf32>
    %247 = vector.broadcast %246 : vector<2x1xf32> to vector<2x20xf32>
    %248 = arith.mulf %247, %14 : vector<2x20xf32>
    %249 = vector.extract_strided_slice %241 {offsets = [0, 2], sizes = [2, 1], strides = [1, 1]} : vector<2x5xf32> to vector<2x1xf32>
    %250 = vector.broadcast %249 : vector<2x1xf32> to vector<2x20xf32>
    %251 = arith.mulf %250, %17 : vector<2x20xf32>
    %252 = vector.extract_strided_slice %241 {offsets = [0, 3], sizes = [2, 1], strides = [1, 1]} : vector<2x5xf32> to vector<2x1xf32>
    %253 = vector.broadcast %252 : vector<2x1xf32> to vector<2x20xf32>
    %254 = arith.mulf %253, %20 : vector<2x20xf32>
    %255 = vector.extract_strided_slice %241 {offsets = [0, 4], sizes = [2, 1], strides = [1, 1]} : vector<2x5xf32> to vector<2x1xf32>
    %256 = vector.broadcast %255 : vector<2x1xf32> to vector<2x20xf32>
    %257 = arith.mulf %256, %23 : vector<2x20xf32>
    %258 = arith.addf %245, %248 : vector<2x20xf32>
    %259 = arith.addf %251, %254 : vector<2x20xf32>
    %260 = arith.addf %258, %259 : vector<2x20xf32>
    %261 = arith.addf %260, %257 : vector<2x20xf32>
    %262 = arith.addf %242, %261 : vector<2x20xf32>
    %263 = math.tanh %262 : vector<2x20xf32>
    %264 = vector.extract_strided_slice %263 {offsets = [0, 0], sizes = [2, 15], strides = [1, 1]} : vector<2x20xf32> to vector<2x15xf32>
    %cst_20 = arith.constant 5.000000e-01 : f32
    %265 = vector.broadcast %cst_20 : f32 to vector<2x15xf32>
    %266 = arith.mulf %265, %264 : vector<2x15xf32>
    %cst_21 = arith.constant 5.000000e-01 : f32
    %267 = vector.broadcast %cst_21 : f32 to vector<2x15xf32>
    %268 = arith.addf %266, %267 : vector<2x15xf32>
    %269 = vector.extract_strided_slice %268 {offsets = [0, 0], sizes = [2, 5], strides = [1, 1]} : vector<2x15xf32> to vector<2x5xf32>
    %270 = vector.extract_strided_slice %268 {offsets = [0, 5], sizes = [2, 5], strides = [1, 1]} : vector<2x15xf32> to vector<2x5xf32>
    %271 = vector.extract_strided_slice %268 {offsets = [0, 10], sizes = [2, 5], strides = [1, 1]} : vector<2x15xf32> to vector<2x5xf32>
    %272 = vector.extract_strided_slice %263 {offsets = [0, 15], sizes = [2, 5], strides = [1, 1]} : vector<2x20xf32> to vector<2x5xf32>
    %273 = arith.mulf %270, %239 : vector<2x5xf32>
    %274 = arith.mulf %269, %272 : vector<2x5xf32>
    %275 = arith.addf %273, %274 : vector<2x5xf32>
    %276 = math.tanh %275 : vector<2x5xf32>
    %277 = arith.mulf %271, %276 : vector<2x5xf32>
    %278 = vector.extract_strided_slice %8 {offsets = [14, 0], sizes = [2, 20], strides = [1, 1]} : vector<16x20xf32> to vector<2x20xf32>
    %279 = vector.extract_strided_slice %277 {offsets = [0, 0], sizes = [2, 1], strides = [1, 1]} : vector<2x5xf32> to vector<2x1xf32>
    %280 = vector.broadcast %279 : vector<2x1xf32> to vector<2x20xf32>
    %281 = arith.mulf %280, %11 : vector<2x20xf32>
    %282 = vector.extract_strided_slice %277 {offsets = [0, 1], sizes = [2, 1], strides = [1, 1]} : vector<2x5xf32> to vector<2x1xf32>
    %283 = vector.broadcast %282 : vector<2x1xf32> to vector<2x20xf32>
    %284 = arith.mulf %283, %14 : vector<2x20xf32>
    %285 = vector.extract_strided_slice %277 {offsets = [0, 2], sizes = [2, 1], strides = [1, 1]} : vector<2x5xf32> to vector<2x1xf32>
    %286 = vector.broadcast %285 : vector<2x1xf32> to vector<2x20xf32>
    %287 = arith.mulf %286, %17 : vector<2x20xf32>
    %288 = vector.extract_strided_slice %277 {offsets = [0, 3], sizes = [2, 1], strides = [1, 1]} : vector<2x5xf32> to vector<2x1xf32>
    %289 = vector.broadcast %288 : vector<2x1xf32> to vector<2x20xf32>
    %290 = arith.mulf %289, %20 : vector<2x20xf32>
    %291 = vector.extract_strided_slice %277 {offsets = [0, 4], sizes = [2, 1], strides = [1, 1]} : vector<2x5xf32> to vector<2x1xf32>
    %292 = vector.broadcast %291 : vector<2x1xf32> to vector<2x20xf32>
    %293 = arith.mulf %292, %23 : vector<2x20xf32>
    %294 = arith.addf %281, %284 : vector<2x20xf32>
    %295 = arith.addf %287, %290 : vector<2x20xf32>
    %296 = arith.addf %294, %295 : vector<2x20xf32>
    %297 = arith.addf %296, %293 : vector<2x20xf32>
    %298 = arith.addf %278, %297 : vector<2x20xf32>
    %299 = math.tanh %298 : vector<2x20xf32>
    %300 = vector.extract_strided_slice %299 {offsets = [0, 0], sizes = [2, 15], strides = [1, 1]} : vector<2x20xf32> to vector<2x15xf32>
    %cst_22 = arith.constant 5.000000e-01 : f32
    %301 = vector.broadcast %cst_22 : f32 to vector<2x15xf32>
    %302 = arith.mulf %301, %300 : vector<2x15xf32>
    %cst_23 = arith.constant 5.000000e-01 : f32
    %303 = vector.broadcast %cst_23 : f32 to vector<2x15xf32>
    %304 = arith.addf %302, %303 : vector<2x15xf32>
    %305 = vector.extract_strided_slice %304 {offsets = [0, 0], sizes = [2, 5], strides = [1, 1]} : vector<2x15xf32> to vector<2x5xf32>
    %306 = vector.extract_strided_slice %304 {offsets = [0, 5], sizes = [2, 5], strides = [1, 1]} : vector<2x15xf32> to vector<2x5xf32>
    %307 = vector.extract_strided_slice %304 {offsets = [0, 10], sizes = [2, 5], strides = [1, 1]} : vector<2x15xf32> to vector<2x5xf32>
    %308 = vector.extract_strided_slice %299 {offsets = [0, 15], sizes = [2, 5], strides = [1, 1]} : vector<2x20xf32> to vector<2x5xf32>
    %309 = arith.mulf %306, %275 : vector<2x5xf32>
    %310 = arith.mulf %305, %308 : vector<2x5xf32>
    %311 = arith.addf %309, %310 : vector<2x5xf32>
    %312 = math.tanh %311 : vector<2x5xf32>
    %313 = arith.mulf %307, %312 : vector<2x5xf32>
    %cst_24 = arith.constant 0.000000e+00 : f32
    %314 = vector.broadcast %cst_24 : f32 to vector<2x5xf32>
    %315 = arith.maximumf %313, %314 : vector<2x5xf32>
    %c0_25 = arith.constant 0 : index
    %c0_26 = arith.constant 0 : index
    %316 = vector.load %arg4[%c0_25, %c0_26] : memref<1x5xf32, #tpu.memory_space<vmem>>, vector<1x5xf32>
    %317 = vector.broadcast %316 : vector<1x5xf32> to vector<2x5xf32>
    %318 = arith.mulf %315, %317 : vector<2x5xf32>
    %cst_27 = arith.constant dense<0.000000e+00> : vector<2xf32>
    %319 = vector.multi_reduction <add>, %318, %cst_27 [1] : vector<2x5xf32> to vector<2xf32>
    %320 = vector.shape_cast %319 : vector<2xf32> to vector<2x1xf32>
    %c0_28 = arith.constant 0 : index
    %c0_29 = arith.constant 0 : index
    %321 = vector.load %arg5[%c0_28, %c0_29] : memref<1x1xf32, #tpu.memory_space<vmem>>, vector<1x1xf32>
    %322 = vector.broadcast %321 : vector<1x1xf32> to vector<2x1xf32>
    %323 = arith.addf %320, %322 : vector<2x1xf32>
    %c0_30 = arith.constant 0 : index
    %c0_31 = arith.constant 0 : index
    %324 = vector.load %arg6[%c0_30, %c0_31] : memref<2x1xf32, #tpu.memory_space<vmem>>, vector<2x1xf32>
    tpu.vector_store %arg6[%c0_30, %c0_31], %323 {strides = array<i32>} : memref<2x1xf32, #tpu.memory_space<vmem>>, vector<2x1xf32>,
    return
  }
}

</mosaic_0001>

<bundles_post_ra>
// kernel: tpu_custom_call.1
= control target key start
LH: loop header
LB: loop body
LE: loop exit
PB: predicated region body
PF: predicated region fallthrough
CT: control target
= control target key end

     0   :  { %v621_v0 = vmov 0   ;;  %v56_v2 = vlaneseq  ;;  %s622_s28 = smov 113   ;;  %v624_v38 = vmov 11   ;;  %v625_v39 = vmov 10   ;;  %s629_s7 = smov 10   ;;  %s821_s0 = inlined_call_operand.vmem [shape: f32[16,1], index: 0, kind: input, shape index: {}]   ;;  %s822_s2 = inlined_call_operand.vmem [shape: f32[5,20], index: 2, kind: input, shape index: {}]   ;;  %s823_s1 = inlined_call_operand.vmem [shape: f32[1,20], index: 1, kind: input, shape index: {}]   ;;  %s824_s3 = inlined_call_operand.vmem [shape: f32[1,20], index: 3, kind: input, shape index: {}]   ;;  %s825_s4 = inlined_call_operand.vmem [shape: f32[1,5], index: 4, kind: input, shape index: {}]   ;;  %s826_s5 = inlined_call_operand.<no memory space> [shape: f32[1,1], index: 5, kind: input, shape index: {}]   ;;  %s827_s6 = inlined_call_operand.vmem [shape: f32[2,1], index: 6, kind: output, shape index: {}]  }
   0x1   :  { %552 = vset.pattern.permute.xlu0 %v621_v0  ;;  %v26_v1 = vld [vmem:[%s821_s0] sm:$0xff]  ;;  %554 = vset.pattern.permute.xlu1 %v624_v38  ;;  %v626_v43 = vmov 12   ;;  %v627_v44 = vmov 13   ;;  %v628_v45 = vmov 14   ;;  %vm520_vm0 = vcmask 39942  }
   0x2   :  { %31 = vperm.xlu0 %552, %v26_v1   ;;  %v57_v3 = vshrl.u32 %v56_v2, 7  ;;  %v25_v8 = vld [vmem:[%s822_s2] sm:$0x1f]  ;;  %vm532_vm1 = vcmask 7174  }
   0x3   :  { %v691_v23 = vld [vmem:[%s823_s1] ss:$0 sm:$0xff]  ;;  %s623_s1 = smov 5  }
   0x4   :  { %v58_v4 = vsub.s32 0, %v57_v3  ;;  %v62_v5 = vsub.s32 1, %v57_v3  ;;  %v66_v6 = vsub.s32 2, %v57_v3  ;;  %v70_v7 = vsub.s32 3, %v57_v3  ;;  %v696_v24 = vld [vmem:[%s824_s3] ss:$0 sm:$0xff] }
   0x5   :  { %v74_v13 = vsub.s32 4, %v57_v3 }
   0x6   :  { %v673_v9 = vrot.slane %v25_v8, %v58_v4  ;;  %v675_v10 = vrot.slane %v25_v8, %v62_v5  ;;  %v677_v11 = vrot.slane %v25_v8, %v66_v6  ;;  %v679_v12 = vrot.slane %v25_v8, %v70_v7  ;;  %553 = vset.pattern.permute.xlu0 %v625_v39 }
   0x7   :  { %v685_v18 = vrot.slane %v25_v8, %v74_v13 }
   0x8   :  { %v76_v14 = vmul.f32 0.0, %v673_v9  ;;  %v77_v15 = vmul.f32 0.0, %v675_v10  ;;  %v78_v16 = vmul.f32 0.0, %v677_v11  ;;  %v79_v17 = vmul.f32 0.0, %v679_v12 }
   0x9   :  { %v80_v21 = vmul.f32 0.0, %v685_v18 }
   0xa   :  { %v81_v19 = vadd.f32 %v77_v15, %v76_v14  ;;  %v82_v20 = vadd.f32 %v79_v17, %v78_v16 }
   0xc   :  { %v83_v22 = vadd.f32 %v82_v20, %v81_v19 }
   0xe   :  { %v84_v26 = vadd.f32 %v83_v22, %v80_v21 }
  0x81   :  { %v32_v25 = vpop.permute.xlu0 %31 }
  0x82   :  { %v45_v27 = vmul.f32 %v691_v23, %v32_v25 }
  0x84   :  { %v700_v28 = vadd.f32 %v696_v24, %v45_v27 }
  0x86   :  { %v85_v29 = vadd.f32 %v84_v26, %v700_v28 }
  0x88   :  { %589 = vtanh.f32 %v85_v29 }
  0x92   :  { %v590_v30 = vpop.eup %589 }
  0x93   :  { %91 = vrot.lane.b32.xlu0 %v590_v30, %s622_s28  ;;  %v87_v31 = vmul.f32 0.5, %v590_v30 }
  0x95   :  { %v88_v32 = vadd.f32 0.5, %v87_v31 }
  0x97   :  { %v89_v35 = vmul.f32 0.0, %v88_v32 }
 0x105   :  { %v92_v33 = vpop.permute.xlu0 %91 }
 0x106   :  { %v94_v34 = vmul.f32 %v92_v33, %v88_v32 }
 0x108   :  { %96 = vrot.lane.b32.xlu1 %v94_v34, %s623_s1 }
 0x17a   :  { %v97_v36 = vpop.permute.xlu1 %96 }
 0x17b   :  { %v99_v37 = vadd.f32 %v97_v36, %v89_v35 }
 0x17d   :  { %591 = vtanh.f32 %v99_v37  ;;  %v144_v4 = vrot.slane %v99_v37, 6 }
 0x187   :  { %v592_v40 = vpop.eup %591 }
 0x188   :  { %102 = vrot.lane.b32.xlu1 %v592_v40, %s623_s1 }
 0x1fa   :  { %v103_v41 = vpop.permute.xlu1 %102 }
 0x1fb   :  { %v105_v42 = vmul.f32 %v103_v41, %v88_v32 }
 0x1fd   :  { %113 = vperm.xlu1 %554, %v105_v42   ;;  %108 = vperm.xlu0 %553, %v105_v42  }
 0x201   :  { %555 = vset.pattern.permute.xlu1 %v626_v43  ;;  %556 = vset.pattern.permute.xlu0 %v627_v44 }
 0x202   :  { %118 = vperm.xlu1 %555, %v105_v42   ;;  %123 = vperm.xlu0 %556, %v105_v42  }
 0x206   :  { %557 = vset.pattern.permute.xlu1 %v628_v45  ;;  %558 = vset.pattern.permute.xlu0 %v625_v39 }
 0x207   :  { %128 = vperm.xlu1 %557, %v105_v42  }
 0x20b   :  { %559 = vset.pattern.permute.xlu1 %v624_v38 }
 0x27c   :  { %v114_v46 = vpop.permute.xlu1 %113  ;;  %v109_v47 = vpop.permute.xlu0 %108 }
 0x27d   :  { %v116_v48 = vmul.f32 %v114_v46, %v675_v10  ;;  %v111_v49 = vmul.f32 %v109_v47, %v673_v9 }
 0x27f   :  { %v132_v54 = vadd.f32 %v116_v48, %v111_v49 }
 0x281   :  { %v119_v50 = vpop.permute.xlu1 %118  ;;  %v124_v51 = vpop.permute.xlu0 %123 }
 0x282   :  { %v121_v52 = vmul.f32 %v119_v50, %v677_v11  ;;  %v126_v53 = vmul.f32 %v124_v51, %v679_v12 }
 0x284   :  { %v133_v55 = vadd.f32 %v126_v53, %v121_v52 }
 0x286   :  { %v129_v56 = vpop.permute.xlu1 %128  ;;  %v134_v57 = vadd.f32 %v133_v55, %v132_v54 }
 0x287   :  { %v131_v58 = vmul.f32 %v129_v56, %v685_v18 }
 0x289   :  { %v135_v59 = vadd.f32 %v134_v57, %v131_v58 }
 0x28b   :  { %v137_v60 = vrot.slane %v135_v59, 6 }
 0x28d   :  { %v139_v61 = vadd.f32 %v137_v60, %v700_v28 }
 0x28f   :  { %593 = vtanh.f32 %v139_v61 }
 0x299   :  { %v594_v62 = vpop.eup %593 }
 0x29a   :  { %148 = vrot.lane.b32.xlu1 %v594_v62, %s622_s28  ;;  %v141_v63 = vmul.f32 0.5, %v594_v62 }
 0x29c   :  { %v142_v1 = vadd.f32 0.5, %v141_v63 }
 0x29e   :  { %v146_v5 = vmul.f32 %v144_v4, %v142_v1 }
 0x30c   :  { %v149_v2 = vpop.permute.xlu1 %148 }
 0x30d   :  { %v151_v3 = vmul.f32 %v149_v2, %v142_v1 }
 0x30f   :  { %153 = vrot.lane.b32.xlu0 %v151_v3, %s623_s1 }
 0x381   :  { %v154_v6 = vpop.permute.xlu0 %153 }
 0x382   :  { %v156_v7 = vadd.f32 %v154_v6, %v146_v5 }
 0x384   :  { %595 = vtanh.f32 %v156_v7  ;;  %v201_v42 = vrot.slane %v156_v7, 6 }
 0x38e   :  { %v596_v8 = vpop.eup %595 }
 0x38f   :  { %159 = vrot.lane.b32.xlu1 %v596_v8, %s623_s1 }
 0x401   :  { %v160_v13 = vpop.permute.xlu1 %159 }
 0x402   :  { %v162_v14 = vmul.f32 %v160_v13, %v142_v1 }
 0x404   :  { %170 = vperm.xlu1 %559, %v162_v14   ;;  %165 = vperm.xlu0 %558, %v162_v14  }
 0x408   :  { %560 = vset.pattern.permute.xlu1 %v626_v43  ;;  %561 = vset.pattern.permute.xlu0 %v627_v44 }
 0x409   :  { %175 = vperm.xlu1 %560, %v162_v14   ;;  %180 = vperm.xlu0 %561, %v162_v14  }
 0x40d   :  { %562 = vset.pattern.permute.xlu1 %v628_v45  ;;  %563 = vset.pattern.permute.xlu0 %v625_v39 }
 0x40e   :  { %185 = vperm.xlu1 %562, %v162_v14  }
 0x412   :  { %564 = vset.pattern.permute.xlu1 %v624_v38 }
 0x483   :  { %v171_v15 = vpop.permute.xlu1 %170  ;;  %v166_v16 = vpop.permute.xlu0 %165 }
 0x484   :  { %v173_v17 = vmul.f32 %v171_v15, %v675_v10  ;;  %v168_v19 = vmul.f32 %v166_v16, %v673_v9 }
 0x486   :  { %v189_v26 = vadd.f32 %v173_v17, %v168_v19 }
 0x488   :  { %v176_v20 = vpop.permute.xlu1 %175  ;;  %v181_v21 = vpop.permute.xlu0 %180 }
 0x489   :  { %v178_v22 = vmul.f32 %v176_v20, %v677_v11  ;;  %v183_v25 = vmul.f32 %v181_v21, %v679_v12  ;;  %v27_v21 = vld [vmem:[%s821_s0 + $0x8] sm:$0xff] }
 0x48b   :  { %v190_v27 = vadd.f32 %v183_v25, %v178_v22 }
 0x48d   :  { %v186_v29 = vpop.permute.xlu1 %185  ;;  %v191_v30 = vadd.f32 %v190_v27, %v189_v26 }
 0x48e   :  { %v188_v31 = vmul.f32 %v186_v29, %v685_v18 }
 0x490   :  { %v192_v32 = vadd.f32 %v191_v30, %v188_v31 }
 0x492   :  { %v194_v33 = vrot.slane %v192_v32, 6 }
 0x494   :  { %v196_v34 = vadd.f32 %v194_v33, %v700_v28 }
 0x496   :  { %597 = vtanh.f32 %v196_v34 }
 0x4a0   :  { %v598_v35 = vpop.eup %597 }
 0x4a1   :  { %205 = vrot.lane.b32.xlu1 %v598_v35, %s622_s28  ;;  %v198_v36 = vmul.f32 0.5, %v598_v35 }
 0x4a3   :  { %v199_v37 = vadd.f32 0.5, %v198_v36 }
 0x4a5   :  { %v203_v46 = vmul.f32 %v201_v42, %v199_v37 }
 0x513   :  { %v206_v40 = vpop.permute.xlu1 %205 }
 0x514   :  { %v208_v41 = vmul.f32 %v206_v40, %v199_v37 }
 0x516   :  { %210 = vrot.lane.b32.xlu0 %v208_v41, %s623_s1 }
 0x588   :  { %v211_v47 = vpop.permute.xlu0 %210 }
 0x589   :  { %v213_v48 = vadd.f32 %v211_v47, %v203_v46 }
 0x58b   :  { %599 = vtanh.f32 %v213_v48  ;;  %v258_v14 = vrot.slane %v213_v48, 6 }
 0x595   :  { %v600_v49 = vpop.eup %599 }
 0x596   :  { %216 = vrot.lane.b32.xlu1 %v600_v49, %s623_s1 }
 0x608   :  { %v217_v50 = vpop.permute.xlu1 %216 }
 0x609   :  { %v219_v51 = vmul.f32 %v217_v50, %v199_v37 }
 0x60b   :  { %227 = vperm.xlu1 %564, %v219_v51   ;;  %222 = vperm.xlu0 %563, %v219_v51  }
 0x60f   :  { %565 = vset.pattern.permute.xlu1 %v626_v43  ;;  %566 = vset.pattern.permute.xlu0 %v627_v44 }
 0x610   :  { %232 = vperm.xlu1 %565, %v219_v51   ;;  %237 = vperm.xlu0 %566, %v219_v51  }
 0x614   :  { %567 = vset.pattern.permute.xlu1 %v628_v45  ;;  %568 = vset.pattern.permute.xlu0 %v625_v39 }
 0x615   :  { %242 = vperm.xlu1 %567, %v219_v51  }
 0x619   :  { %569 = vset.pattern.permute.xlu1 %v624_v38 }
 0x68a   :  { %v228_v52 = vpop.permute.xlu1 %227  ;;  %v223_v53 = vpop.permute.xlu0 %222 }
 0x68b   :  { %v230_v54 = vmul.f32 %v228_v52, %v675_v10  ;;  %v225_v55 = vmul.f32 %v223_v53, %v673_v9 }
 0x68d   :  { %v246_v60 = vadd.f32 %v230_v54, %v225_v55 }
 0x68f   :  { %v233_v56 = vpop.permute.xlu1 %232  ;;  %v238_v57 = vpop.permute.xlu0 %237 }
 0x690   :  { %v235_v58 = vmul.f32 %v233_v56, %v677_v11  ;;  %v240_v59 = vmul.f32 %v238_v57, %v679_v12 }
 0x692   :  { %v247_v61 = vadd.f32 %v240_v59, %v235_v58 }
 0x694   :  { %v243_v62 = vpop.permute.xlu1 %242  ;;  %v248_v63 = vadd.f32 %v247_v61, %v246_v60 }
 0x695   :  { %v245_v1 = vmul.f32 %v243_v62, %v685_v18 }
 0x697   :  { %v249_v2 = vadd.f32 %v248_v63, %v245_v1 }
 0x699   :  { %v251_v3 = vrot.slane %v249_v2, 6 }
 0x69b   :  { %v253_v4 = vadd.f32 %v251_v3, %v700_v28 }
 0x69d   :  { %601 = vtanh.f32 %v253_v4 }
 0x6a7   :  { %v602_v5 = vpop.eup %601 }
 0x6a8   :  { %262 = vrot.lane.b32.xlu1 %v602_v5, %s622_s28  ;;  %v255_v6 = vmul.f32 0.5, %v602_v5 }
 0x6aa   :  { %v256_v7 = vadd.f32 0.5, %v255_v6 }
 0x6ac   :  { %v260_v15 = vmul.f32 %v258_v14, %v256_v7 }
 0x71a   :  { %v263_v8 = vpop.permute.xlu1 %262 }
 0x71b   :  { %v265_v13 = vmul.f32 %v263_v8, %v256_v7 }
 0x71d   :  { %267 = vrot.lane.b32.xlu0 %v265_v13, %s623_s1 }
 0x78f   :  { %v268_v16 = vpop.permute.xlu0 %267 }
 0x790   :  { %v270_v17 = vadd.f32 %v268_v16, %v260_v15 }
 0x792   :  { %603 = vtanh.f32 %v270_v17  ;;  %v315_v53 = vrot.slane %v270_v17, 6 }
 0x79c   :  { %v604_v19 = vpop.eup %603 }
 0x79d   :  { %273 = vrot.lane.b32.xlu1 %v604_v19, %s623_s1 }
 0x80f   :  { %v274_v20 = vpop.permute.xlu1 %273 }
 0x810   :  { %v276_v28 = vmul.f32 %v274_v20, %v256_v7 }
 0x812   :  { %284 = vperm.xlu1 %569, %v276_v28   ;;  %279 = vperm.xlu0 %568, %v276_v28  }
 0x816   :  { %570 = vset.pattern.permute.xlu1 %v626_v43  ;;  %571 = vset.pattern.permute.xlu0 %v627_v44 }
 0x817   :  { %289 = vperm.xlu1 %570, %v276_v28   ;;  %294 = vperm.xlu0 %571, %v276_v28  }
 0x81b   :  { %572 = vset.pattern.permute.xlu1 %v628_v45  ;;  %575 = vset.pattern.permute.xlu0 %v624_v38 }
 0x81c   :  { %299 = vperm.xlu1 %572, %v276_v28  }
 0x820   :  { %573 = vset.pattern.permute.xlu1 %v621_v0 }
 0x821   :  { %36 = vperm.xlu1 %573, %v27_v21  }
 0x825   :  { %574 = vset.pattern.permute.xlu1 %v625_v39 }
 0x891   :  { %v285_v22 = vpop.permute.xlu1 %284  ;;  %v280_v25 = vpop.permute.xlu0 %279 }
 0x892   :  { %v287_v26 = vmul.f32 %v285_v22, %v675_v10  ;;  %v282_v27 = vmul.f32 %v280_v25, %v673_v9 }
 0x894   :  { %v303_v33 = vadd.f32 %v287_v26, %v282_v27 }
 0x896   :  { %v290_v29 = vpop.permute.xlu1 %289  ;;  %v295_v30 = vpop.permute.xlu0 %294 }
 0x897   :  { %v292_v31 = vmul.f32 %v290_v29, %v677_v11  ;;  %v297_v32 = vmul.f32 %v295_v30, %v679_v12 }
 0x899   :  { %v304_v34 = vadd.f32 %v297_v32, %v292_v31 }
 0x89b   :  { %v300_v35 = vpop.permute.xlu1 %299  ;;  %v305_v36 = vadd.f32 %v304_v34, %v303_v33 }
 0x89c   :  { %v302_v0 = vmul.f32 %v300_v35, %v685_v18 }
 0x89e   :  { %v306_v37 = vadd.f32 %v305_v36, %v302_v0 }
 0x8a0   :  { %v37_v40 = vpop.permute.xlu1 %36  ;;  %v308_v42 = vrot.slane %v306_v37, 6 }
 0x8a1   :  { %v46_v41 = vmul.f32 %v691_v23, %v37_v40 }
 0x8a3   :  { %v766_v46 = vadd.f32 %v696_v24, %v46_v41 }
 0x8a5   :  { %v310_v47 = vadd.f32 %v308_v42, %v766_v46 }
 0x8a7   :  { %605 = vtanh.f32 %v310_v47 }
 0x8b1   :  { %v606_v48 = vpop.eup %605 }
 0x8b2   :  { %319 = vrot.lane.b32.xlu0 %v606_v48, %s622_s28  ;;  %v312_v49 = vmul.f32 0.5, %v606_v48 }
 0x8b4   :  { %v313_v50 = vadd.f32 0.5, %v312_v49 }
 0x8b6   :  { %v317_v54 = vmul.f32 %v315_v53, %v313_v50 }
 0x924   :  { %v320_v51 = vpop.permute.xlu0 %319 }
 0x925   :  { %v322_v52 = vmul.f32 %v320_v51, %v313_v50 }
 0x927   :  { %324 = vrot.lane.b32.xlu1 %v322_v52, %s623_s1 }
 0x999   :  { %v325_v55 = vpop.permute.xlu1 %324 }
 0x99a   :  { %v327_v23 = vadd.f32 %v325_v55, %v317_v54 }
 0x99c   :  { %607 = vtanh.f32 %v327_v23  ;;  %v372_v28 = vrot.slane %v327_v23, 6 }
 0x9a6   :  { %v608_v56 = vpop.eup %607 }
 0x9a7   :  { %330 = vrot.lane.b32.xlu0 %v608_v56, %s623_s1 }
 0xa19   :  { %v331_v24 = vpop.permute.xlu0 %330 }
 0xa1a   :  { %v333_v57 = vmul.f32 %v331_v24, %v313_v50 }
 0xa1c   :  { %341 = vperm.xlu0 %575, %v333_v57   ;;  %336 = vperm.xlu1 %574, %v333_v57  }
 0xa20   :  { %578 = vset.pattern.permute.xlu0 %v628_v45  ;;  %576 = vset.pattern.permute.xlu1 %v626_v43 }
 0xa21   :  { %356 = vperm.xlu0 %578, %v333_v57   ;;  %346 = vperm.xlu1 %576, %v333_v57  }
 0xa25   :  { %577 = vset.pattern.permute.xlu1 %v627_v44  ;;  %580 = vset.pattern.permute.xlu0 %v624_v38 }
 0xa26   :  { %351 = vperm.xlu1 %577, %v333_v57  }
 0xa2a   :  { %579 = vset.pattern.permute.xlu1 %v625_v39 }
 0xa9b   :  { %v337_v58 = vpop.permute.xlu1 %336  ;;  %v342_v60 = vpop.permute.xlu0 %341 }
 0xa9c   :  { %v344_v61 = vmul.f32 %v342_v60, %v675_v10  ;;  %v339_v62 = vmul.f32 %v337_v58, %v673_v9 }
 0xa9e   :  { %v360_v4 = vadd.f32 %v344_v61, %v339_v62 }
 0xaa0   :  { %v347_v59 = vpop.permute.xlu1 %346  ;;  %v357_v3 = vpop.permute.xlu0 %356 }
 0xaa1   :  { %v349_v1 = vmul.f32 %v347_v59, %v677_v11  ;;  %v359_v6 = vmul.f32 %v357_v3, %v685_v18 }
 0xaa5   :  { %v352_v63 = vpop.permute.xlu1 %351 }
 0xaa6   :  { %v354_v2 = vmul.f32 %v352_v63, %v679_v12 }
 0xaa8   :  { %v361_v5 = vadd.f32 %v354_v2, %v349_v1 }
 0xaaa   :  { %v362_v7 = vadd.f32 %v361_v5, %v360_v4 }
 0xaac   :  { %v363_v8 = vadd.f32 %v362_v7, %v359_v6 }
 0xaae   :  { %v365_v13 = vrot.slane %v363_v8, 6 }
 0xab0   :  { %v367_v14 = vadd.f32 %v365_v13, %v766_v46 }
 0xab2   :  { %609 = vtanh.f32 %v367_v14 }
 0xabc   :  { %v610_v15 = vpop.eup %609 }
 0xabd   :  { %376 = vrot.lane.b32.xlu1 %v610_v15, %s622_s28  ;;  %v369_v16 = vmul.f32 0.5, %v610_v15 }
 0xabf   :  { %v370_v17 = vadd.f32 0.5, %v369_v16 }
 0xac1   :  { %v374_v21 = vmul.f32 %v372_v28, %v370_v17 }
 0xb2f   :  { %v377_v19 = vpop.permute.xlu1 %376 }
 0xb30   :  { %v379_v20 = vmul.f32 %v377_v19, %v370_v17  ;;  %v11_v19 = vstv %s826_s5 }
 0xb31   :  { %12 = vst [vmem:[#allocation2] sm:$0x1] %v11_v19 }
 0xb32   :  { %381 = vrot.lane.b32.xlu1 %v379_v20, %s623_s1 }
 0xba4   :  { %v382_v22 = vpop.permute.xlu1 %381 }
 0xba5   :  { %v384_v25 = vadd.f32 %v382_v22, %v374_v21 }
 0xba7   :  { %611 = vtanh.f32 %v384_v25  ;;  %v429_v54 = vrot.slane %v384_v25, 6 }
 0xbb1   :  { %v612_v26 = vpop.eup %611 }
 0xbb2   :  { %387 = vrot.lane.b32.xlu0 %v612_v26, %s623_s1 }
 0xc24   :  { %v388_v27 = vpop.permute.xlu0 %387 }
 0xc25   :  { %v390_v29 = vmul.f32 %v388_v27, %v370_v17 }
 0xc27   :  { %398 = vperm.xlu0 %580, %v390_v29   ;;  %393 = vperm.xlu1 %579, %v390_v29  }
 0xc2b   :  { %583 = vset.pattern.permute.xlu0 %v628_v45  ;;  %581 = vset.pattern.permute.xlu1 %v626_v43 }
 0xc2c   :  { %413 = vperm.xlu0 %583, %v390_v29   ;;  %403 = vperm.xlu1 %581, %v390_v29  }
 0xc30   :  { %582 = vset.pattern.permute.xlu1 %v627_v44  ;;  %585 = vset.pattern.permute.xlu0 %v624_v38 }
 0xc31   :  { %408 = vperm.xlu1 %582, %v390_v29   ;;  %v541_v29 = vld [vmem:[#allocation2] ss:$0 sm:$0xff] }
 0xc35   :  { %584 = vset.pattern.permute.xlu1 %v625_v39 }
 0xca6   :  { %v394_v30 = vpop.permute.xlu1 %393  ;;  %v399_v32 = vpop.permute.xlu0 %398 }
 0xca7   :  { %v401_v33 = vmul.f32 %v399_v32, %v675_v10  ;;  %v396_v34 = vmul.f32 %v394_v30, %v673_v9 }
 0xca9   :  { %v417_v40 = vadd.f32 %v401_v33, %v396_v34 }
 0xcab   :  { %v404_v31 = vpop.permute.xlu1 %403  ;;  %v414_v37 = vpop.permute.xlu0 %413 }
 0xcac   :  { %v406_v36 = vmul.f32 %v404_v31, %v677_v11  ;;  %v416_v38 = vmul.f32 %v414_v37, %v685_v18 }
 0xcb0   :  { %v409_v35 = vpop.permute.xlu1 %408 }
 0xcb1   :  { %v411_v0 = vmul.f32 %v409_v35, %v679_v12 }
 0xcb3   :  { %v418_v41 = vadd.f32 %v411_v0, %v406_v36 }
 0xcb5   :  { %v419_v42 = vadd.f32 %v418_v41, %v417_v40 }
 0xcb7   :  { %v420_v47 = vadd.f32 %v419_v42, %v416_v38 }
 0xcb9   :  { %v422_v39 = vrot.slane %v420_v47, 6 }
 0xcbb   :  { %v424_v48 = vadd.f32 %v422_v39, %v766_v46 }
 0xcbd   :  { %613 = vtanh.f32 %v424_v48 }
 0xcc7   :  { %v614_v49 = vpop.eup %613 }
 0xcc8   :  { %433 = vrot.lane.b32.xlu1 %v614_v49, %s622_s28  ;;  %v426_v50 = vmul.f32 0.5, %v614_v49 }
 0xcca   :  { %v427_v51 = vadd.f32 0.5, %v426_v50 }
 0xccc   :  { %v431_v55 = vmul.f32 %v429_v54, %v427_v51 }
 0xd3a   :  { %v434_v52 = vpop.permute.xlu1 %433 }
 0xd3b   :  { %v436_v53 = vmul.f32 %v434_v52, %v427_v51 }
 0xd3d   :  { %438 = vrot.lane.b32.xlu1 %v436_v53, %s623_s1 }
 0xdaf   :  { %v439_v23 = vpop.permute.xlu1 %438 }
 0xdb0   :  { %v441_v56 = vadd.f32 %v439_v23, %v431_v55 }
 0xdb2   :  { %615 = vtanh.f32 %v441_v56 }
 0xdbc   :  { %v616_v24 = vpop.eup %615 }
 0xdbd   :  { %444 = vrot.lane.b32.xlu0 %v616_v24, %s623_s1 }
 0xe2f   :  { %v445_v57 = vpop.permute.xlu0 %444 }
 0xe30   :  { %v447_v58 = vmul.f32 %v445_v57, %v427_v51 }
 0xe32   :  { %455 = vperm.xlu0 %585, %v447_v58   ;;  %450 = vperm.xlu1 %584, %v447_v58  }
 0xe36   :  { %588 = vset.pattern.permute.xlu0 %v628_v45  ;;  %586 = vset.pattern.permute.xlu1 %v626_v43 }
 0xe37   :  { %470 = vperm.xlu0 %588, %v447_v58   ;;  %460 = vperm.xlu1 %586, %v447_v58  }
 0xe3b   :  { %587 = vset.pattern.permute.xlu1 %v627_v44 }
 0xe3c   :  { %465 = vperm.xlu1 %587, %v447_v58  }
 0xeb1   :  { %v451_v59 = vpop.permute.xlu1 %450  ;;  %v456_v61 = vpop.permute.xlu0 %455 }
 0xeb2   :  { %v458_v62 = vmul.f32 %v456_v61, %v675_v10  ;;  %v453_v63 = vmul.f32 %v451_v59, %v673_v9 }
 0xeb4   :  { %v474_v4 = vadd.f32 %v458_v62, %v453_v63 }
 0xeb6   :  { %v461_v60 = vpop.permute.xlu1 %460  ;;  %v471_v45 = vpop.permute.xlu0 %470 }
 0xeb7   :  { %v463_v2 = vmul.f32 %v461_v60, %v677_v11  ;;  %v473_v5 = vmul.f32 %v471_v45, %v685_v18  ;;  %v486_v18 = vrot.slane %v441_v56, 6 }
 0xebb   :  { %v466_v1 = vpop.permute.xlu1 %465 }
 0xebc   :  { %v468_v3 = vmul.f32 %v466_v1, %v679_v12  ;;  %v540_v12 = vld [vmem:[%s825_s4] ss:$0 sm:$0xff]  ;;  %s630_s4 = smov 118  }
 0xebe   :  { %v475_v43 = vadd.f32 %v468_v3, %v463_v2 }
 0xec0   :  { %v476_v6 = vadd.f32 %v475_v43, %v474_v4 }
 0xec2   :  { %v477_v44 = vadd.f32 %v476_v6, %v473_v5 }
 0xec4   :  { %v479_v7 = vrot.slane %v477_v44, 6 }
 0xec6   :  { %v481_v8 = vadd.f32 %v479_v7, %v766_v46 }
 0xec8   :  { %617 = vtanh.f32 %v481_v8 }
 0xed2   :  { %v618_v13 = vpop.eup %617 }
 0xed3   :  { %490 = vrot.lane.b32.xlu1 %v618_v13, %s622_s28  ;;  %v483_v9 = vmul.f32 0.5, %v618_v13 }
 0xed5   :  { %v484_v10 = vadd.f32 0.5, %v483_v9 }
 0xed7   :  { %v488_v15 = vmul.f32 %v486_v18, %v484_v10 }
 0xf45   :  { %v491_v14 = vpop.permute.xlu1 %490 }
 0xf46   :  { %v493_v11 = vmul.f32 %v491_v14, %v484_v10 }
 0xf48   :  { %495 = vrot.lane.b32.xlu1 %v493_v11, %s623_s1 }
 0xf4c   :  { %512 = vrot.lane.b32.xlu1 %v540_v12, %s629_s7 }
 0xfba   :  { %v496_v16 = vpop.permute.xlu1 %495 }
 0xfbb   :  { %v498_v46 = vadd.f32 %v496_v16, %v488_v15 }
 0xfbd   :  { %619 = vtanh.f32 %v498_v46 }
 0xfbe   :  { %v513_v21 = vpop.permute.xlu1 %512 }
 0xfc7   :  { %v620_v17 = vpop.eup %619 }
 0xfc8   :  { %501 = vrot.lane.b32.xlu0 %v620_v17, %s623_s1 }
0x103a   :  { %v502_v20 = vpop.permute.xlu0 %501 }
0x103b   :  { %v504_v28 = vmul.f32 %v502_v20, %v484_v10 }
0x103d   :  { %v505_v22 = vmax.f32 %v504_v28, 0.0 }
0x103f   :  { %v515_v25 = vmul.f32 %v513_v21, %v505_v22 }
0x1041   :  { %517 = vrot.lane.b32.xlu0 %v515_v25, %s630_s4 }
0x10b3   :  { %v518_v26 = vpop.permute.xlu0 %517 }
0x10b4   :  { %v521_v27 = vsel %vm520_vm0, %v518_v26, 0.0 }
0x10b5   :  { %522 = vadd.xlane.f32.xlu1 %v521_v27 }
0x1142   :  { %v523_v30 = vpop.xlane.xlu1 %522 }
0x1143   :  { %v531_v31 = vadd.f32 %v541_v29, %v523_v30 }
0x1145   :  { %533 = vst.msk [vmem:[%s827_s6 - $0x6] sm:$0xc0] %vm532_vm1, %v531_v31 }

</bundles_post_ra>
